<compile_context>
chip_gen: v6e
topology: v6e:2x2x1
jax: 0.10.0
libtpu: 0.0.40
codegen_flags: <defaults>
</compile_context>

<pallas_src>
import jax
import jax.numpy as jnp
from jax.experimental import pallas as pl
from jax.experimental.pallas import tpu as pltpu


def _time_embedding_kernel(t_ref, w1_ref, b1_ref, w2_ref, b2_ref, o_ref):
    # t: [tb, 1] (any numeric dtype), w1/b1: [1, H] f32, w2: [H, D] bf16, b2: [1, D] f32,
    # o: [tb, D].
    t = t_ref[...].astype(jnp.float32)                    # t.float().view(-1, 1)
    # Linear(1, H): K=1 contraction -> broadcast multiply on the VPU.
    h = t * w1_ref[...] + b1_ref[...]                     # [tb, H] f32
    h = h * jax.nn.sigmoid(h)                             # SiLU (sigmoid on the EUP)
    # Linear(H, D) on the MXU: bf16 operands, f32 accumulate.
    out = jnp.dot(h.astype(jnp.bfloat16), w2_ref[...],
                  preferred_element_type=jnp.float32)
    out = out + b2_ref[...]
    o_ref[...] = out.astype(o_ref.dtype)


def prepare_params(w1, b1, w2, b2):
    """One-time parameter prep (kept out of the per-call path).

    w1: [1, H], b1: [H], w2: [H, D], b2: [D]
    (weights are already laid out [in, out], i.e. the transpose of PyTorch's .weight)
    """
    H = w1.shape[1]
    D = w2.shape[1]
    return dict(
        w1=w1.astype(jnp.float32).reshape(1, H),
        b1=b1.astype(jnp.float32).reshape(1, H),
        w2=w2.astype(jnp.bfloat16),                       # halves the dominant HBM->VMEM DMA
        b2=b2.astype(jnp.float32).reshape(1, D),
    )


def time_embedding(t, params, *, block_b=256, out_dtype=jnp.float32):
    """t: [B] (or [B, 1]) any numeric dtype. Returns [B, dim] in out_dtype."""
    w1, b1, w2, b2 = params["w1"], params["b1"], params["w2"], params["b2"]
    H = w1.shape[1]
    D = w2.shape[1]
    t2 = t.reshape(-1, 1)                                 # float cast happens inside the kernel
    B = t2.shape[0]

    if B <= block_b:
        # Small batch: gridless call, all operands resident in VMEM, one kernel invocation.
        vmem = pl.BlockSpec(memory_space=pltpu.MemorySpace.VMEM)
        return pl.pallas_call(
            _time_embedding_kernel,
            out_shape=jax.ShapeDtypeStruct((B, D), out_dtype),
            in_specs=[vmem, vmem, vmem, vmem, vmem],
            out_specs=vmem,
        )(t2, w1, b1, w2, b2)

    # Large batch: tile B (parallel axis). Weight BlockSpecs have constant index_maps so the
    # weight tiles are not re-DMA'd per B tile.
    n_blocks = pl.cdiv(B, block_b)
    Bp = n_blocks * block_b
    if Bp != B:
        t2 = jnp.pad(t2, ((0, Bp - B), (0, 0)))
    out = pl.pallas_call(
        _time_embedding_kernel,
        out_shape=jax.ShapeDtypeStruct((Bp, D), out_dtype),
        grid=(n_blocks,),
        in_specs=[
            pl.BlockSpec((block_b, 1), lambda i: (i, 0)),
            pl.BlockSpec((1, H), lambda i: (0, 0)),
            pl.BlockSpec((1, H), lambda i: (0, 0)),
            pl.BlockSpec((H, D), lambda i: (0, 0)),
            pl.BlockSpec((1, D), lambda i: (0, 0)),
        ],
        out_specs=pl.BlockSpec((block_b, D), lambda i: (i, 0)),
        compiler_params=pltpu.CompilerParams(
            dimension_semantics=("parallel",),
        ),
    )(t2, w1, b1, w2, b2)
    return out[:B] if Bp != B else out


def _reference_f32(t, w1, b1, w2, b2):
    """Plain-JAX reference matching the PyTorch module exactly (all f32)."""
    tf = t.astype(jnp.float32).reshape(-1, 1)
    h = tf @ w1 + b1
    h = h * jax.nn.sigmoid(h)
    return h @ w2 + b2


def _reference_bf16_matmul(t, w1, b1, w2_bf16, b2):
    """Reference using the same bf16 second-matmul path as the kernel."""
    tf = t.astype(jnp.float32).reshape(-1, 1)
    h = tf @ w1 + b1
    h = h * jax.nn.sigmoid(h)
    return jnp.dot(h.astype(jnp.bfloat16), w2_bf16,
                   preferred_element_type=jnp.float32) + b2


if __name__ == "__main__":
    # Shapes consistent with the module: dim=256 -> hidden=128. Small batch=8 (gridless path)
    # plus batch=300 (non-divisible) to exercise the B-tiled grid path.
    DIM = 256
    HID = DIM // 2

    key = jax.random.PRNGKey(0)
    k_t, k_tb, k_w1, k_b1, k_w2, k_b2 = jax.random.split(key, 6)

    t_small = jax.random.randint(k_t, (8,), 0, 1000).astype(jnp.int32)       # timesteps [B]
    t_large = jax.random.randint(k_tb, (300,), 0, 1000).astype(jnp.int32)

    w1 = jax.random.normal(k_w1, (1, HID), jnp.float32) * 0.1                # Linear(1, HID) W^T
    b1 = jax.random.normal(k_b1, (HID,), jnp.float32) * 0.1
    w2 = jax.random.normal(k_w2, (HID, DIM), jnp.float32) * 0.1              # Linear(HID, DIM) W^T
    b2 = jax.random.normal(k_b2, (DIM,), jnp.float32) * 0.1

    params = prepare_params(w1, b1, w2, b2)

    # --- small batch: gridless path ---
    out_s = jax.block_until_ready(time_embedding(t_small, params))
    assert out_s.shape == (8, DIM)

    ref_f32 = _reference_f32(t_small, w1, b1.reshape(1, HID), w2, b2.reshape(1, DIM))
    ref_bf16 = _reference_bf16_matmul(t_small, w1, b1.reshape(1, HID),
                                      params["w2"], b2.reshape(1, DIM))
    # Tight check vs a reference using the same bf16 matmul path.
    assert jnp.allclose(out_s, ref_bf16, atol=5e-2, rtol=1e-3), "mismatch vs bf16-path reference"
    # Relaxed check vs the exact f32 PyTorch semantics (bf16 second matmul shifts numerics slightly).
    assert jnp.allclose(out_s, ref_f32, atol=2.0, rtol=5e-2), "mismatch vs f32 reference"

    # --- large batch: B-tiled parallel path (with pad + slice) ---
    out_l = jax.block_until_ready(time_embedding(t_large, params, block_b=128))
    assert out_l.shape == (300, DIM)
    ref_l = _reference_bf16_matmul(t_large, w1, b1.reshape(1, HID),
                                   params["w2"], b2.reshape(1, DIM))
    assert jnp.allclose(out_l, ref_l, atol=5e-2, rtol=1e-3), "mismatch vs reference (tiled path)"

    print("KERNEL_OK")
</pallas_src>

<mosaic_0001>
module attributes {stable_mosaic.version = 11 : i64} {
  func.func @_time_embedding_kernel(%arg0: memref<8x1xi32, #tpu.memory_space<vmem>>, %arg1: memref<1x128xf32, #tpu.memory_space<vmem>>, %arg2: memref<1x128xf32, #tpu.memory_space<vmem>>, %arg3: memref<128x256xbf16, #tpu.memory_space<vmem>>, %arg4: memref<1x256xf32, #tpu.memory_space<vmem>>, %arg5: memref<8x256xf32, #tpu.memory_space<vmem>>) attributes {dimension_semantics = [], scalar_prefetch = 0 : i64, scratch_operands = 0 : i64, tpu.core_type = #tpu.core_type<tc>} {
    %c0 = arith.constant 0 : index
    %c0_0 = arith.constant 0 : index
    %0 = vector.load %arg0[%c0, %c0_0] : memref<8x1xi32, #tpu.memory_space<vmem>>, vector<8x1xi32>
    %1 = arith.sitofp %0 : vector<8x1xi32> to vector<8x1xf32>
    %c0_1 = arith.constant 0 : index
    %c0_2 = arith.constant 0 : index
    %2 = vector.load %arg1[%c0_1, %c0_2] : memref<1x128xf32, #tpu.memory_space<vmem>>, vector<1x128xf32>
    %3 = vector.broadcast %1 : vector<8x1xf32> to vector<8x128xf32>
    %4 = vector.broadcast %2 : vector<1x128xf32> to vector<8x128xf32>
    %5 = arith.mulf %3, %4 : vector<8x128xf32>
    %c0_3 = arith.constant 0 : index
    %c0_4 = arith.constant 0 : index
    %6 = vector.load %arg2[%c0_3, %c0_4] : memref<1x128xf32, #tpu.memory_space<vmem>>, vector<1x128xf32>
    %7 = vector.broadcast %6 : vector<1x128xf32> to vector<8x128xf32>
    %8 = arith.addf %5, %7 : vector<8x128xf32>
    %9 = arith.negf %8 : vector<8x128xf32>
    %10 = math.exp %9 : vector<8x128xf32>
    %cst = arith.constant 1.000000e+00 : f32
    %11 = vector.broadcast %cst : f32 to vector<8x128xf32>
    %12 = arith.addf %11, %10 : vector<8x128xf32>
    %13 = arith.divf %11, %12 : vector<8x128xf32>
    %14 = arith.mulf %8, %13 : vector<8x128xf32>
    %15 = arith.truncf %14 : vector<8x128xf32> to vector<8x128xbf16>
    %c0_5 = arith.constant 0 : index
    %c0_6 = arith.constant 0 : index
    %16 = vector.load %arg3[%c0_5, %c0_6] : memref<128x256xbf16, #tpu.memory_space<vmem>>, vector<128x256xbf16>
    %cst_7 = arith.constant dense<0.000000e+00> : vector<8x256xf32>
    %17 = tpu.matmul %15, %16, %cst_7 {dimension_numbers = #tpu.dot_dimension_numbers<[1], [0], [0], [1], [0, 0, 1, 1], [], []>} : vector<8x128xbf16>, vector<128x256xbf16>, vector<8x256xf32> -> vector<8x256xf32>
    %c0_8 = arith.constant 0 : index
    %c0_9 = arith.constant 0 : index
    %18 = vector.load %arg4[%c0_8, %c0_9] : memref<1x256xf32, #tpu.memory_space<vmem>>, vector<1x256xf32>
    %19 = vector.broadcast %18 : vector<1x256xf32> to vector<8x256xf32>
    %20 = arith.addf %17, %19 : vector<8x256xf32>
    %c0_10 = arith.constant 0 : index
    %c0_11 = arith.constant 0 : index
    %21 = vector.load %arg5[%c0_10, %c0_11] : memref<8x256xf32, #tpu.memory_space<vmem>>, vector<8x256xf32>
    tpu.vector_store %arg5[%c0_10, %c0_11], %20 {strides = array<i32>} : memref<8x256xf32, #tpu.memory_space<vmem>>, vector<8x256xf32>,
    return
  }
}

</mosaic_0001>

<bundles_post_ra>
// kernel: tpu_custom_call.1
= control target key start
LH: loop header
LB: loop body
LE: loop exit
PB: predicated region body
PF: predicated region fallthrough
CT: control target
= control target key end

     0   :  { %10 = vsyncpa [#allocation3], 0  ;;  %s383_s0 = inlined_call_operand.vmem [shape: s32[8,1], index: 0, kind: input, shape index: {}]   ;;  %s384_s1 = inlined_call_operand.vmem [shape: f32[1,128], index: 1, kind: input, shape index: {}]   ;;  %s385_s2 = inlined_call_operand.vmem [shape: f32[1,128], index: 2, kind: input, shape index: {}]   ;;  %s386_s3 = inlined_call_operand.hbm [shape: bf16[128,256], index: 3, kind: input, shape index: {}]   ;;  %s387_s4 = inlined_call_operand.vmem [shape: f32[1,256], index: 4, kind: input, shape index: {}]   ;;  %s388_s5 = inlined_call_operand.hbm [shape: f32[8,256], index: 5, kind: output, shape index: {}]  }
   0x1   :  { %11 = vsyncpa [#allocation4], 0  ;;  %s330_s18 = smov [#allocation2]  }
   0x2   :  { %s23_s19 = sshll.u32 %s330_s18, 4  ;;  %s24_s19 = int_to_ptr.vmem [resolvable:$true] %s23_s19 }
   0x3   :  { %s294_s20 = scalar_lea.vmem %s24_s19, 2048  ;;  %p299_p1 = scmp.lt.s32.totalorder %s24_s19, %s24_s19 }
   0x4   :  { %p295_p0 = scmp.ne.s32.totalorder %s24_s19, %s294_s20  ;;  %p300_p2 = scmp.lt.s32.totalorder %s294_s20, %s294_s20 }
   0x6   :  { %p301_p3 = por %p300_p2, %p299_p1 }
   0x8   :  { %p302_p4 = pnand %p301_p3, %p295_p0 }
   0xa   :  { %305 = shalt.err (!%p302_p4)
}
   0xb   :  { %s331_s21 = smov 128   ;;  %s332_s22 = smov 8  }
   0xc   :  { %29 = dma.hbm_to_vmem [thread:$0]  %s386_s3, 2048, %s24_s19, [#allocation3], %s331_s21, %s331_s21, %s332_s22  }
   0xd   :  { %326 = dma.done.wait [#allocation3], 2048  }
   0xe   :  { %327 = vsyncadd [#allocation3], 4294965248  ;;  %v333_v0 = vmov 0   ;;  %v36_v1 = vld [vmem:[%s383_s0] sm:$0xff]  ;;  %v258_v3 = vld [vmem:[#allocation2 + $0x74] ss:$8 sps:$4 sm:$0xff]   ;;  %v85_v30 = vlaneseq }
   0xf   :  { %257 = vset.pattern.permute.xlu0 %v333_v0  ;;  %207 = vmatprep.mubr.bf16.mxu0 %v333_v0  ;;  %v37_v2 = vcvt.s32.f32 %v36_v1  ;;  %v260_v4 = vld [vmem:[#allocation2 + $0x70] ss:$8 sps:$4 sm:$0xff]   ;;  %v261_v5 = vld [vmem:[#allocation2 + $0x64] ss:$8 sps:$4 sm:$0xff]   ;;  %v263_v6 = vld [vmem:[#allocation2 + $0x60] ss:$8 sps:$4 sm:$0xff]  }
  0x10   :  { %175 = vmatprep.subr.bf16.mxu0 %v258_v3  ;;  %v264_v7 = vld [vmem:[#allocation2 + $0x54] ss:$8 sps:$4 sm:$0xff]   ;;  %v266_v8 = vld [vmem:[#allocation2 + $0x50] ss:$8 sps:$4 sm:$0xff]   ;;  %v267_v9 = vld [vmem:[#allocation2 + $0x44] ss:$8 sps:$4 sm:$0xff]  }
  0x11   :  { %41 = vperm.xlu0 %257, %v37_v2   ;;  %176 = vmatpush1.bf16.msra.mxu0 %v260_v4  ;;  %v269_v10 = vld [vmem:[#allocation2 + $0x40] ss:$8 sps:$4 sm:$0xff]   ;;  %v270_v11 = vld [vmem:[#allocation2 + $0x34] ss:$8 sps:$4 sm:$0xff]   ;;  %v272_v12 = vld [vmem:[#allocation2 + $0x30] ss:$8 sps:$4 sm:$0xff]  }
  0x12   :  { %177 = vmatprep.subr.bf16.mxu0 %v261_v5  ;;  %v273_v13 = vld [vmem:[#allocation2 + $0x24] ss:$8 sps:$4 sm:$0xff]   ;;  %v275_v14 = vld [vmem:[#allocation2 + $0x20] ss:$8 sps:$4 sm:$0xff]   ;;  %v276_v15 = vld [vmem:[#allocation2 + $0x14] ss:$8 sps:$4 sm:$0xff]  }
  0x13   :  { %v278_v16 = vld [vmem:[#allocation2 + $0x10] ss:$8 sps:$4 sm:$0xff]   ;;  %v279_v17 = vld [vmem:[#allocation2 + $0x4] ss:$8 sps:$4 sm:$0xff]   ;;  %v281_v18 = vld [vmem:[#allocation2] ss:$8 sps:$4 sm:$0xff]  }
  0x14   :  { %v233_v19 = vld [vmem:[%s384_s1] ss:$0 sm:$0xff]  ;;  %v86_v31 = vshrl.u32 %v85_v30, 7 }
  0x15   :  { %178 = vmatpush1.bf16.msra.mxu0 %v263_v6  ;;  %v234_v20 = vld [vmem:[%s385_s2] ss:$0 sm:$0xff]  ;;  %s334_s2 = smov [#allocation5]  }
  0x16   :  { %179 = vmatprep.subr.bf16.mxu0 %v264_v7  ;;  %v87_v32 = vsub.s32 0, %v86_v31  ;;  %v83_v33 = vld [vmem:[%s387_s4] sm:$0x3]  ;;  %v91_v34 = vsub.s32 1, %v86_v31  ;;  %s224_s30 = sshll.u32 %s334_s2, 4  ;;  %s225_s30 = int_to_ptr.vmem [resolvable:$true] %s224_s30 }
  0x17   :  { %s306_s6 = scalar_lea.vmem %s225_s30, 256  ;;  %p311_p6 = scmp.lt.s32.totalorder %s225_s30, %s225_s30 }
  0x18   :  { %v88_v35 = vrot.slane %v83_v33, %v87_v32  ;;  %v92_v36 = vrot.slane %v83_v33, %v91_v34  ;;  %p307_p5 = scmp.ne.s32.totalorder %s225_s30, %s306_s6  ;;  %p312_p7 = scmp.lt.s32.totalorder %s306_s6, %s306_s6 }
  0x19   :  { %180 = vmatpush1.bf16.msra.mxu0 %v266_v8 }
  0x1a   :  { %181 = vmatprep.subr.bf16.mxu0 %v267_v9  ;;  %p313_p8 = por %p312_p7, %p311_p6 }
  0x1c   :  { %p314_p9 = pnand %p313_p8, %p307_p5 }
  0x1d   :  { %182 = vmatpush1.bf16.msra.mxu0 %v269_v10 }
  0x1e   :  { %183 = vmatprep.subr.bf16.mxu0 %v270_v11 }
  0x21   :  { %184 = vmatpush1.bf16.msra.mxu0 %v272_v12 }
  0x22   :  { %185 = vmatprep.subr.bf16.mxu0 %v273_v13 }
  0x25   :  { %186 = vmatpush1.bf16.msra.mxu0 %v275_v14 }
  0x26   :  { %187 = vmatprep.subr.bf16.mxu0 %v276_v15 }
  0x29   :  { %188 = vmatpush1.bf16.msra.mxu0 %v278_v16 }
  0x2a   :  { %189 = vmatprep.subr.bf16.mxu0 %v279_v17 }
  0x2d   :  { %190 = vmatpush1.bf16.msra.mxu0 %v281_v18 }
  0x8c   :  { %v42_v21 = vpop.permute.xlu0 %41 }
  0x8d   :  { %v50_v22 = vmul.f32 %v233_v19, %v42_v21 }
  0x8f   :  { %v58_v23 = vadd.f32 %v234_v20, %v50_v22 }
  0x91   :  { %v235_v24 = vmul.f32 -1.442695, %v58_v23 }
  0x93   :  { %282 = vpow2.f32 %v235_v24 }
  0xa0   :  { %v283_v25 = vpop.eup %282 }
  0xa1   :  { %v62_v26 = vadd.f32 1.0, %v283_v25 }
  0xa3   :  { %284 = vrcp.f32 %v62_v26 }
  0xb0   :  { %v285_v27 = vpop.eup %284 }
  0xb1   :  { %v65_v28 = vmul.f32 %v285_v27, %v58_v23 }
  0xb3   :  { %v66_v29 = vpack.c.bf16 %v65_v28, %v65_v28 }
  0xb5   :  { %208 = vmatmul.mubr.bf16.vlgmr.msra.gmra.mxu0 %v66_v29 }
 0x175   :  { %v209_v37 = vpop.f32.mrf.mxu0 }
 0x176   :  { %v210_v38 = vadd.f32 %v209_v37, %v88_v35 }
 0x177   :  { %v211_v39 = vpop.f32.mrf.mxu0 }
 0x178   :  { %216 = vst [vmem:[#allocation5] sm:$0xff] %v210_v38  ;;  %v212_v40 = vadd.f32 %v211_v39, %v92_v36 }
 0x179   :  { %v213_v41 = vpop.f32.mrf.mxu0 }
 0x17a   :  { %217 = vst [vmem:[#allocation5 + $0x8] sm:$0xff] %v212_v40 }
 0x17b   :  { %v214_v42 = vpop.f32.mrf.mxu0 }
 0x17c   :  { %317 = shalt.err (!%p314_p9)
}
 0x17d   :  { %227 = dma.vmem_to_hbm [thread:$0]  %s225_s30, 256, %s388_s5, [#allocation4]  }
 0x17e   :  { %328 = dma.done.wait [#allocation4], 256  }
 0x17f   :  { %329 = vsyncadd [#allocation4], 4294967040 }
 0x180   :  { %231 = vsyncpa [#allocation3], 1 }
 0x181   :  { %232 = vsyncpa [#allocation4], 1 }

</bundles_post_ra>
